<compile_context>
chip_gen: v6e
topology: v6e:2x2x1
jax: 0.10.0
libtpu: 0.0.40
codegen_flags: <defaults>
</compile_context>

<pallas_src>
import functools

import jax
import jax.numpy as jnp
from jax.experimental import pallas as pl
from jax.experimental.pallas import tpu as pltpu

_INV_SQRT2 = 0.7071067811865476
_VMEM_HEADROOM = 6 * 1024 * 1024  # leave room for compiler-internal scratch


def _cdiv(a, b):
    return -(-a // b)


def _round_up(n, m):
    return ((n + m - 1) // m) * m


def _gelu_exact_f32(h):
    # Exact (erf-based) GELU in f32 — matches nn.GELU() default.
    return 0.5 * h * (1.0 + jax.lax.erf(h * _INV_SQRT2))


# ---------------------------------------------------------------------------
# Kernel A: resident weights (W1/W2 live in VMEM), token tiles streamed.
# ---------------------------------------------------------------------------
def _mlp_kernel(x_ref, w1_ref, b1_ref, w2_ref, b2_ref, o_ref):
    x = x_ref[...]  # native dtype: bf16 inputs take the fast MXU path
    h = jnp.dot(x, w1_ref[...], preferred_element_type=jnp.float32)
    h = h + b1_ref[...].astype(jnp.float32)
    h = _gelu_exact_f32(h)
    # dropout1 / dropout2: identity (eval mode).
    out = jnp.dot(h.astype(w2_ref.dtype), w2_ref[...],
                  preferred_element_type=jnp.float32)
    out = out + b2_ref[...].astype(jnp.float32)
    o_ref[...] = out.astype(o_ref.dtype)


# ---------------------------------------------------------------------------
# Kernel B: hidden-dim tiled fallback for weight sets that exceed the VMEM
# budget. Second grid axis (last, "arbitrary") runs over hidden chunks; the
# second matmul accumulates into a f32 VMEM scratch.
# ---------------------------------------------------------------------------
def _mlp_kernel_htiled(x_ref, w1_ref, b1_ref, w2_ref, b2_ref, o_ref, acc_ref):
    th = pl.program_id(1)

    @pl.when(th == 0)
    def _():
        acc_ref[...] = jnp.zeros_like(acc_ref)

    h = jnp.dot(x_ref[...], w1_ref[...], preferred_element_type=jnp.float32)
    h = h + b1_ref[...].astype(jnp.float32)
    h = _gelu_exact_f32(h)
    acc_ref[...] += jnp.dot(h.astype(w2_ref.dtype), w2_ref[...],
                            preferred_element_type=jnp.float32)

    @pl.when(th == pl.num_programs(1) - 1)
    def _():
        o_ref[...] = (acc_ref[...]
                      + b2_ref[...].astype(jnp.float32)).astype(o_ref.dtype)


# ---------------------------------------------------------------------------
# VMEM budgeting helpers.
# ---------------------------------------------------------------------------
def _vmem_capacity_bytes():
    try:
        return int(pltpu.get_tpu_info().vmem_capacity_bytes)
    except Exception:
        return 64 * 1024 * 1024  # conservative: v7x per-TensorCore VMEM


def _resident_need_bytes(tm, ep, hp, act_bytes, w_bytes):
    """Resident-weight kernel: weights single-buffered, x/out double-buffered,
    plus f32 intermediates."""
    weights = 2 * ep * hp * w_bytes + (ep + hp) * w_bytes
    tiles = 2 * tm * ep * act_bytes + 2 * tm * ep * act_bytes  # x + out, 2-deep
    interm = tm * hp * 4 + tm * ep * 4                         # f32 hidden + out
    return int((weights + tiles + interm) * 1.2)


def _htiled_need_bytes(tm, ep, th, act_bytes, w_bytes):
    """Hidden-tiled kernel: weight chunks double-buffered (they stream)."""
    weights = 2 * (ep * th + th * ep + th) * w_bytes + ep * w_bytes
    tiles = 2 * tm * ep * act_bytes + 2 * tm * ep * act_bytes
    interm = tm * th * 4 + tm * ep * 4                         # f32 hidden + acc
    return int((weights + tiles + interm) * 1.2)


def _maybe_single_buffered(shape, index_map):
    """Constant-index operand: one VMEM buffer is enough (saves weight VMEM)."""
    try:
        return pl.BlockSpec(shape, index_map, pipeline_mode=pl.Buffered(1))
    except Exception:  # API without pipeline_mode support — fall back cleanly
        return pl.BlockSpec(shape, index_map)


def _token_tile(m, block_m):
    """8-aligned token tile; split so >=2 grid tiles exist when M allows it
    (keeps both v7x TensorCores busy under dimension_semantics='parallel')."""
    if m <= 8:
        return 8
    if m <= block_m:
        return max(8, _round_up(_cdiv(m, 2), 8))
    return block_m


# ---------------------------------------------------------------------------
# Forward wrapper.
# ---------------------------------------------------------------------------
@functools.partial(jax.jit, static_argnames=("block_m", "hidden_block"))
def mlp_forward(x, w1, b1, w2, b2, *, block_m=None, hidden_block=None):
    """x: [B, S, E] -> [B, S, E].  Weights: w1 [E, H], w2 [H, E] (PyTorch W^T)."""
    B, S, E = x.shape
    H = w1.shape[1]
    M = B * S

    act_dt = x.dtype
    act_bytes = jnp.dtype(act_dt).itemsize
    w_bytes = jnp.dtype(w1.dtype).itemsize

    cap = _vmem_capacity_bytes()
    budget_cap = max(cap - _VMEM_HEADROOM, 32 * 1024 * 1024)

    # Default token tile: 512 where VMEM is plentiful (v5e/v6e: 128 MiB),
    # 256 on v7x (64 MiB per TensorCore).
    if block_m is None:
        block_m = 512 if cap >= 96 * 1024 * 1024 else 256

    # Lane-dense feature padding only when genuinely required.
    Ep = _round_up(E, 128)
    Hp = _round_up(H, 128)

    TM = _token_tile(M, block_m)

    # Path selection: resident weights if they fit the per-core budget,
    # otherwise hidden-dim tiling (or when hidden_block is forced).
    use_htiled = hidden_block is not None
    if not use_htiled:
        use_htiled = _resident_need_bytes(TM, Ep, Hp, act_bytes, w_bytes) > budget_cap

    TH = num_h = None
    if use_htiled:
        TM = _token_tile(M, min(block_m, 256))
        hb = _round_up(max(int(hidden_block) if hidden_block else 2048, 128), 128)
        num_h = max(1, _cdiv(Hp, hb))
        TH = _round_up(_cdiv(Hp, num_h), 128)
        Hp = TH * num_h

    grid_m = _cdiv(M, TM)  # ragged last tile: OOB rows masked, no dead padding

    # Operand prep: skip copies entirely when dims are already 128-aligned.
    x2d = x.reshape(M, E)
    if Ep != E:
        x2d = jnp.pad(x2d, ((0, 0), (0, Ep - E)))
    if Ep != E or Hp != H:
        w1p = jnp.pad(w1, ((0, Ep - E), (0, Hp - H)))
        b1p = jnp.pad(b1, ((0, Hp - H),)).reshape(1, Hp)
        w2p = jnp.pad(w2, ((0, Hp - H), (0, Ep - E)))
        b2p = jnp.pad(b2, ((0, Ep - E),)).reshape(1, Ep)
    else:
        w1p, b1p, w2p, b2p = w1, b1.reshape(1, H), w2, b2.reshape(1, E)

    cost = pl.CostEstimate(
        flops=4 * M * Ep * Hp,            # two matmuls
        transcendentals=M * Hp,           # erf
        bytes_accessed=(2 * M * Ep * act_bytes
                        + (2 * Ep * Hp + Hp + Ep) * w_bytes),
    )

    if not use_htiled:
        need = _resident_need_bytes(TM, Ep, Hp, act_bytes, w_bytes)
        vmem_limit = int(min(max(need, 32 * 1024 * 1024), budget_cap))
        out2d = pl.pallas_call(
            _mlp_kernel,
            out_shape=jax.ShapeDtypeStruct((M, Ep), act_dt),
            grid_spec=pltpu.PrefetchScalarGridSpec(
                num_scalar_prefetch=0,
                grid=(grid_m,),
                in_specs=[
                    pl.BlockSpec((TM, Ep), lambda i: (i, 0)),            # x (streamed)
                    _maybe_single_buffered((Ep, Hp), lambda i: (0, 0)),  # W1 resident
                    _maybe_single_buffered((1, Hp), lambda i: (0, 0)),   # b1 resident
                    _maybe_single_buffered((Hp, Ep), lambda i: (0, 0)),  # W2 resident
                    _maybe_single_buffered((1, Ep), lambda i: (0, 0)),   # b2 resident
                ],
                out_specs=pl.BlockSpec((TM, Ep), lambda i: (i, 0)),
            ),
            compiler_params=pltpu.CompilerParams(
                dimension_semantics=("parallel",),
                vmem_limit_bytes=vmem_limit,
            ),
            cost_estimate=cost,
        )(x2d, w1p, b1p, w2p, b2p)
    else:
        need = _htiled_need_bytes(TM, Ep, TH, act_bytes, w_bytes)
        vmem_limit = int(min(max(need, 32 * 1024 * 1024), budget_cap))
        out2d = pl.pallas_call(
            _mlp_kernel_htiled,
            out_shape=jax.ShapeDtypeStruct((M, Ep), act_dt),
            grid_spec=pltpu.PrefetchScalarGridSpec(
                num_scalar_prefetch=0,
                grid=(grid_m, num_h),
                in_specs=[
                    pl.BlockSpec((TM, Ep), lambda i, h: (i, 0)),         # x (per-m resident)
                    pl.BlockSpec((Ep, TH), lambda i, h: (0, h)),         # W1 chunk (streamed)
                    pl.BlockSpec((1, TH), lambda i, h: (0, h)),          # b1 chunk
                    pl.BlockSpec((TH, Ep), lambda i, h: (h, 0)),         # W2 chunk (streamed)
                    _maybe_single_buffered((1, Ep), lambda i, h: (0, 0)),  # b2 resident
                ],
                out_specs=pl.BlockSpec((TM, Ep), lambda i, h: (i, 0)),   # accumulator-resident
                scratch_shapes=[pltpu.VMEM((TM, Ep), jnp.float32)],
            ),
            compiler_params=pltpu.CompilerParams(
                dimension_semantics=("parallel", "arbitrary"),
                vmem_limit_bytes=vmem_limit,
            ),
            cost_estimate=cost,
        )(x2d, w1p, b1p, w2p, b2p)

    if Ep != E:
        out2d = out2d[:, :E]
    return out2d.reshape(B, S, E)


def init_params(key, embed_dim, hidden_dim, dtype=jnp.float32):
    """Deterministic init mimicking nn.Linear (uniform +/- 1/sqrt(fan_in))."""
    k1, k2, k3, k4 = jax.random.split(key, 4)
    bound1 = 1.0 / jnp.sqrt(embed_dim)
    bound2 = 1.0 / jnp.sqrt(hidden_dim)
    w1 = jax.random.uniform(k1, (embed_dim, hidden_dim), dtype, -bound1, bound1)
    b1 = jax.random.uniform(k2, (hidden_dim,), dtype, -bound1, bound1)
    w2 = jax.random.uniform(k3, (hidden_dim, embed_dim), dtype, -bound2, bound2)
    b2 = jax.random.uniform(k4, (embed_dim,), dtype, -bound2, bound2)
    return w1, b1, w2, b2


if __name__ == "__main__":
    def ref(x, w1, b1, w2, b2):
        h = x @ w1 + b1
        h = jax.nn.gelu(h, approximate=False)
        return h @ w2 + b2

    # --- Test 1: resident-weight fast path (small ViT-like shapes) ---------
    B, S, E, H = 2, 8, 32, 64
    key = jax.random.PRNGKey(0)
    kx, kp = jax.random.split(key)
    x = jax.random.normal(kx, (B, S, E), jnp.float32)
    w1, b1, w2, b2 = init_params(kp, E, H)

    out = jax.block_until_ready(mlp_forward(x, w1, b1, w2, b2))
    ref_out = ref(x, w1, b1, w2, b2)
    assert out.shape == (B, S, E)
    assert jnp.allclose(out, ref_out, atol=1e-5, rtol=1e-5), (
        float(jnp.max(jnp.abs(out - ref_out))))

    # --- Test 2: hidden-tiled fallback + ragged token tiles ----------------
    B2, S2, E2, H2 = 2, 9, 128, 384
    kx2, kp2 = jax.random.split(jax.random.PRNGKey(0))
    x2 = jax.random.normal(kx2, (B2, S2, E2), jnp.float32)
    p2 = init_params(kp2, E2, H2)
    out2 = jax.block_until_ready(mlp_forward(x2, *p2, hidden_block=128))
    ref2 = ref(x2, *p2)
    assert out2.shape == (B2, S2, E2)
    assert jnp.allclose(out2, ref2, atol=2e-4, rtol=2e-4), (
        float(jnp.max(jnp.abs(out2 - ref2))))

    print("KERNEL_OK")
</pallas_src>

<mosaic_0001>
module attributes {stable_mosaic.version = 11 : i64} {
  func.func @_mlp_kernel(%arg0: i32, %arg1: memref<8x128xf32, #tpu.memory_space<vmem>>, %arg2: memref<128x128xf32, #tpu.memory_space<vmem>>, %arg3: memref<1x128xf32, #tpu.memory_space<vmem>>, %arg4: memref<128x128xf32, #tpu.memory_space<vmem>>, %arg5: memref<1x128xf32, #tpu.memory_space<vmem>>, %arg6: memref<8x128xf32, #tpu.memory_space<vmem>>) attributes {dimension_semantics = [#tpu.dimension_semantics<parallel>], iteration_bounds = array<i64: 2>, scalar_prefetch = 0 : i64, scratch_operands = 0 : i64, tpu.core_type = #tpu.core_type<tc>, window_params = [{transform_indices = @transform_0, window_bounds = array<i64: 8, 128>}, {pipeline_mode = #tpu.pipeline_mode<synchronous>, transform_indices = @transform_1, window_bounds = array<i64: 128, 128>}, {pipeline_mode = #tpu.pipeline_mode<synchronous>, transform_indices = @transform_2, window_bounds = array<i64: 1, 128>}, {pipeline_mode = #tpu.pipeline_mode<synchronous>, transform_indices = @transform_3, window_bounds = array<i64: 128, 128>}, {pipeline_mode = #tpu.pipeline_mode<synchronous>, transform_indices = @transform_4, window_bounds = array<i64: 1, 128>}, {transform_indices = @transform_5, window_bounds = array<i64: 8, 128>}]} {
    %c0 = arith.constant 0 : index
    %c0_0 = arith.constant 0 : index
    %0 = vector.load %arg1[%c0, %c0_0] : memref<8x128xf32, #tpu.memory_space<vmem>>, vector<8x128xf32>
    %c0_1 = arith.constant 0 : index
    %c0_2 = arith.constant 0 : index
    %1 = vector.load %arg2[%c0_1, %c0_2] : memref<128x128xf32, #tpu.memory_space<vmem>>, vector<128x128xf32>
    %cst = arith.constant dense<0.000000e+00> : vector<8x128xf32>
    %2 = tpu.matmul %0, %1, %cst {dimension_numbers = #tpu.dot_dimension_numbers<[1], [0], [0], [1], [0, 0, 1, 1], [], []>} : vector<8x128xf32>, vector<128x128xf32>, vector<8x128xf32> -> vector<8x128xf32>
    %c0_3 = arith.constant 0 : index
    %c0_4 = arith.constant 0 : index
    %3 = vector.load %arg3[%c0_3, %c0_4] : memref<1x128xf32, #tpu.memory_space<vmem>>, vector<1x128xf32>
    %4 = vector.broadcast %3 : vector<1x128xf32> to vector<8x128xf32>
    %5 = arith.addf %2, %4 : vector<8x128xf32>
    %cst_5 = arith.constant 5.000000e-01 : f32
    %6 = vector.broadcast %cst_5 : f32 to vector<8x128xf32>
    %7 = arith.mulf %6, %5 : vector<8x128xf32>
    %cst_6 = arith.constant 0.707106769 : f32
    %8 = vector.broadcast %cst_6 : f32 to vector<8x128xf32>
    %9 = arith.mulf %5, %8 : vector<8x128xf32>
    %10 = math.erf %9 : vector<8x128xf32>
    %cst_7 = arith.constant 1.000000e+00 : f32
    %11 = vector.broadcast %cst_7 : f32 to vector<8x128xf32>
    %12 = arith.addf %11, %10 : vector<8x128xf32>
    %13 = arith.mulf %7, %12 : vector<8x128xf32>
    %c0_8 = arith.constant 0 : index
    %c0_9 = arith.constant 0 : index
    %14 = vector.load %arg4[%c0_8, %c0_9] : memref<128x128xf32, #tpu.memory_space<vmem>>, vector<128x128xf32>
    %cst_10 = arith.constant dense<0.000000e+00> : vector<8x128xf32>
    %15 = tpu.matmul %13, %14, %cst_10 {dimension_numbers = #tpu.dot_dimension_numbers<[1], [0], [0], [1], [0, 0, 1, 1], [], []>} : vector<8x128xf32>, vector<128x128xf32>, vector<8x128xf32> -> vector<8x128xf32>
    %c0_11 = arith.constant 0 : index
    %c0_12 = arith.constant 0 : index
    %16 = vector.load %arg5[%c0_11, %c0_12] : memref<1x128xf32, #tpu.memory_space<vmem>>, vector<1x128xf32>
    %17 = vector.broadcast %16 : vector<1x128xf32> to vector<8x128xf32>
    %18 = arith.addf %15, %17 : vector<8x128xf32>
    %c0_13 = arith.constant 0 : index
    %c0_14 = arith.constant 0 : index
    %19 = vector.load %arg6[%c0_13, %c0_14] : memref<8x128xf32, #tpu.memory_space<vmem>>, vector<8x128xf32>
    tpu.vector_store %arg6[%c0_13, %c0_14], %18 {strides = array<i32>} : memref<8x128xf32, #tpu.memory_space<vmem>>, vector<8x128xf32>,
    return
  }
  func.func @transform_0(%arg0: i32) -> (i32, i32) {
    %c0_i32 = arith.constant 0 : i32
    %c0_i32_0 = arith.constant 0 : i32
    return %arg0, %c0_i32 : i32, i32
  }
  func.func @transform_1(%arg0: i32) -> (i32, i32) {
    %c0_i32 = arith.constant 0 : i32
    %c0_i32_0 = arith.constant 0 : i32
    %c0_i32_1 = arith.constant 0 : i32
    return %c0_i32, %c0_i32_0 : i32, i32
  }
  func.func @transform_2(%arg0: i32) -> (i32, i32) {
    %c0_i32 = arith.constant 0 : i32
    %c0_i32_0 = arith.constant 0 : i32
    %c0_i32_1 = arith.constant 0 : i32
    return %c0_i32, %c0_i32_0 : i32, i32
  }
  func.func @transform_3(%arg0: i32) -> (i32, i32) {
    %c0_i32 = arith.constant 0 : i32
    %c0_i32_0 = arith.constant 0 : i32
    %c0_i32_1 = arith.constant 0 : i32
    return %c0_i32, %c0_i32_0 : i32, i32
  }
  func.func @transform_4(%arg0: i32) -> (i32, i32) {
    %c0_i32 = arith.constant 0 : i32
    %c0_i32_0 = arith.constant 0 : i32
    %c0_i32_1 = arith.constant 0 : i32
    return %c0_i32, %c0_i32_0 : i32, i32
  }
  func.func @transform_5(%arg0: i32) -> (i32, i32) {
    %c0_i32 = arith.constant 0 : i32
    %c0_i32_0 = arith.constant 0 : i32
    return %arg0, %c0_i32 : i32, i32
  }
}

</mosaic_0001>

<bundles_post_ra>
// kernel: mlp_forward.1
= control target key start
LH: loop header
LB: loop body
LE: loop exit
PB: predicated region body
PF: predicated region fallthrough
CT: control target
= control target key end

     0   :  { %s633_s18 = smov 0   ;;  %s797_s0 = inlined_call_operand.vmem [shape: f32[16,128], index: 0, kind: input, shape index: {}]   ;;  %s798_s1 = inlined_call_operand.vmem [shape: f32[128,128], index: 1, kind: input, shape index: {}]   ;;  %s799_s2 = inlined_call_operand.vmem [shape: f32[1,128], index: 2, kind: input, shape index: {}]   ;;  %s800_s3 = inlined_call_operand.vmem [shape: f32[128,128], index: 3, kind: input, shape index: {}]   ;;  %s801_s4 = inlined_call_operand.vmem [shape: f32[1,128], index: 4, kind: input, shape index: {}]   ;;  %s802_s5 = inlined_call_operand.vmem [shape: f32[16,128], index: 5, kind: output, shape index: {}]  }
   0x1 LB: > { %s466_s19 = sadd.s32 4294967295, %s599_s18   ;;  %p470_p0 = scmp.ge.s32.totalorder %s599_s18, 1  ;;  %s599_s18 = sphi %s633_s18, %s15_s18  }
   0x2   : > { %p186_p1 = scmp.lt.s32.totalorder %s599_s18, 3 }
   0x4   : > { %p187_p2 = pnand %p470_p0, %p186_p1 }
   0x5   : > { %p212_p3 = scmp.lt.s32.totalorder (!%p187_p2), %s466_s19, 1 }
   0x6   : > { %190 = sbr.rel (%p187_p2) target bundleno = 455 (0x1c7), region = 40 }
   0xb   : > { %v236_v0 = vld [vmem:[%s798_s1 + $0x78] sm:$0xff]  ;;  %v601_v1 = vmov 0.0   ;;  %v235_v2 = vld [vmem:[%s798_s1 + $0x70] sm:$0xff]  ;;  %vm602_vm0 = vmmov 0   ;;  %v234_v3 = vld [vmem:[%s798_s1 + $0x68] sm:$0xff]  ;;  %s804_s19 = smov (!%p212_p3, %s466_s19), 1 }
   0xc   : > { %511 = vmatprep.subr.mxu0 %v601_v1  ;;  %543 = vmatprep.mubr.msk.f32.mxu0 %vm602_vm0, %v601_v1  ;;  %v233_v4 = vld [vmem:[%s798_s1 + $0x60] sm:$0xff]  ;;  %v334_v5 = vld [vmem:[%s800_s3 + $0x78] sm:$0xff]  ;;  %v333_v6 = vld [vmem:[%s800_s3 + $0x70] sm:$0xff]  ;;  %s471_s6 = sshll.u32 %s804_s19, 3 }
   0xd   : > { %512 = vmatpush3.msra.mxu0 %v236_v0  ;;  %546 = vmatprep.subr.mxu1 %v601_v1  ;;  %v232_v7 = vld [vmem:[%s798_s1 + $0x58] sm:$0xff]  ;;  %v332_v8 = vld [vmem:[%s800_s3 + $0x68] sm:$0xff]  ;;  %v231_v9 = vld [vmem:[%s798_s1 + $0x50] sm:$0xff]  ;;  %s215_s13 = scalar_lea.vmem %s797_s0, %s471_s6  ;;  %s219_s26 = scalar_lea.vmem %s802_s5, %s471_s6 }
   0xe   : > { %513 = vmatprep.subr.mxu0 %v601_v1  ;;  %578 = vmatprep.mubr.msk.f32.mxu1 %vm602_vm0, %v601_v1  ;;  %v331_v10 = vld [vmem:[%s800_s3 + $0x60] sm:$0xff]  ;;  %v230_v11 = vld [vmem:[%s798_s1 + $0x48] sm:$0xff]  ;;  %v228_v13 = vld [vmem:[%s798_s1 + $0x38] sm:$0xff] }
   0xf   : > { %514 = vmatpush3.msra.mxu0 %v235_v2  ;;  %547 = vmatpush3.msra.mxu1 %v334_v5  ;;  %v229_v12 = vld [vmem:[%s798_s1 + $0x40] sm:$0xff]  ;;  %v227_v14 = vld [vmem:[%s798_s1 + $0x30] sm:$0xff]  ;;  %v226_v15 = vld [vmem:[%s798_s1 + $0x28] sm:$0xff] }
  0x10   : > { %515 = vmatprep.subr.mxu0 %v601_v1  ;;  %548 = vmatprep.subr.mxu1 %v601_v1  ;;  %v225_v16 = vld [vmem:[%s798_s1 + $0x20] sm:$0xff]  ;;  %v224_v17 = vld [vmem:[%s798_s1 + $0x18] sm:$0xff]  ;;  %v223_v18 = vld [vmem:[%s798_s1 + $0x10] sm:$0xff] }
  0x11   : > { %516 = vmatpush3.msra.mxu0 %v234_v3  ;;  %549 = vmatpush3.msra.mxu1 %v333_v6  ;;  %v222_v19 = vld [vmem:[%s798_s1 + $0x8] sm:$0xff]  ;;  %v221_v20 = vld [vmem:[%s798_s1] sm:$0xff]  ;;  %v330_v22 = vld [vmem:[%s800_s3 + $0x58] sm:$0xff] }
  0x12   : > { %517 = vmatprep.subr.mxu0 %v601_v1  ;;  %550 = vmatprep.subr.mxu1 %v601_v1  ;;  %v220_v21 = vld [vmem:[%s215_s13] sm:$0xff]  ;;  %v329_v23 = vld [vmem:[%s800_s3 + $0x50] sm:$0xff]  ;;  %v328_v24 = vld [vmem:[%s800_s3 + $0x48] sm:$0xff] }
  0x13   : > { %518 = vmatpush3.msra.mxu0 %v233_v4  ;;  %551 = vmatpush3.msra.mxu1 %v332_v8  ;;  %v327_v25 = vld [vmem:[%s800_s3 + $0x40] sm:$0xff]  ;;  %v326_v26 = vld [vmem:[%s800_s3 + $0x38] sm:$0xff]  ;;  %v325_v27 = vld [vmem:[%s800_s3 + $0x30] sm:$0xff] }
  0x14   : > { %519 = vmatprep.subr.mxu0 %v601_v1  ;;  %552 = vmatprep.subr.mxu1 %v601_v1  ;;  %v324_v28 = vld [vmem:[%s800_s3 + $0x28] sm:$0xff]  ;;  %v323_v29 = vld [vmem:[%s800_s3 + $0x20] sm:$0xff]  ;;  %v322_v30 = vld [vmem:[%s800_s3 + $0x18] sm:$0xff] }
  0x15   : > { %520 = vmatpush3.msra.mxu0 %v232_v7  ;;  %553 = vmatpush3.msra.mxu1 %v331_v10  ;;  %v321_v31 = vld [vmem:[%s800_s3 + $0x10] sm:$0xff]  ;;  %v320_v32 = vld [vmem:[%s800_s3 + $0x8] sm:$0xff]  ;;  %v319_v33 = vld [vmem:[%s800_s3] sm:$0xff] }
  0x16   : > { %521 = vmatprep.subr.mxu0 %v601_v1  ;;  %554 = vmatprep.subr.mxu1 %v601_v1  ;;  %v473_v34 = vld [vmem:[%s799_s2] ss:$0 sm:$0xff] }
  0x17   : > { %522 = vmatpush3.msra.mxu0 %v231_v9  ;;  %555 = vmatpush3.msra.mxu1 %v330_v22  ;;  %v474_v43 = vld [vmem:[%s801_s4] ss:$0 sm:$0xff] }
  0x18   : > { %523 = vmatprep.subr.mxu0 %v601_v1  ;;  %556 = vmatprep.subr.mxu1 %v601_v1 }
  0x19   : > { %524 = vmatpush3.msra.mxu0 %v230_v11  ;;  %557 = vmatpush3.msra.mxu1 %v329_v23 }
  0x1a   : > { %525 = vmatprep.subr.mxu0 %v601_v1  ;;  %558 = vmatprep.subr.mxu1 %v601_v1 }
  0x1b   : > { %526 = vmatpush3.msra.mxu0 %v229_v12  ;;  %559 = vmatpush3.msra.mxu1 %v328_v24 }
  0x1c   : > { %527 = vmatprep.subr.mxu0 %v601_v1  ;;  %560 = vmatprep.subr.mxu1 %v601_v1 }
  0x1d   : > { %528 = vmatpush3.msra.mxu0 %v228_v13  ;;  %561 = vmatpush3.msra.mxu1 %v327_v25 }
  0x1e   : > { %529 = vmatprep.subr.mxu0 %v601_v1  ;;  %562 = vmatprep.subr.mxu1 %v601_v1 }
  0x1f   : > { %530 = vmatpush3.msra.mxu0 %v227_v14  ;;  %563 = vmatpush3.msra.mxu1 %v326_v26 }
  0x20   : > { %531 = vmatprep.subr.mxu0 %v601_v1  ;;  %564 = vmatprep.subr.mxu1 %v601_v1 }
  0x21   : > { %532 = vmatpush3.msra.mxu0 %v226_v15  ;;  %565 = vmatpush3.msra.mxu1 %v325_v27 }
  0x22   : > { %533 = vmatprep.subr.mxu0 %v601_v1  ;;  %566 = vmatprep.subr.mxu1 %v601_v1 }
  0x23   : > { %534 = vmatpush3.msra.mxu0 %v225_v16  ;;  %567 = vmatpush3.msra.mxu1 %v324_v28 }
  0x24   : > { %535 = vmatprep.subr.mxu0 %v601_v1  ;;  %568 = vmatprep.subr.mxu1 %v601_v1 }
  0x25   : > { %536 = vmatpush3.msra.mxu0 %v224_v17  ;;  %569 = vmatpush3.msra.mxu1 %v323_v29 }
  0x26   : > { %537 = vmatprep.subr.mxu0 %v601_v1  ;;  %570 = vmatprep.subr.mxu1 %v601_v1 }
  0x27   : > { %538 = vmatpush3.msra.mxu0 %v223_v18  ;;  %571 = vmatpush3.msra.mxu1 %v322_v30 }
  0x28   : > { %539 = vmatprep.subr.mxu0 %v601_v1  ;;  %572 = vmatprep.subr.mxu1 %v601_v1 }
  0x29   : > { %540 = vmatpush3.msra.mxu0 %v222_v19  ;;  %573 = vmatpush3.msra.mxu1 %v321_v31 }
  0x2a   : > { %541 = vmatprep.subr.mxu0 %v601_v1  ;;  %574 = vmatprep.subr.mxu1 %v601_v1 }
  0x2b   : > { %542 = vmatpush3.msra.mxu0 %v221_v20  ;;  %575 = vmatpush3.msra.mxu1 %v320_v32 }
  0x2c   : > { %544 = vmatmul.mubr.f32.vlgmr.msra.gmra.mxu0 %v220_v21  ;;  %576 = vmatprep.subr.mxu1 %v601_v1 }
  0x2d   : > { %577 = vmatpush3.msra.mxu1 %v319_v33 }
  0xec   : > { %v310_v35 = vpop.f32.mrf.mxu0 }
  0xed   : > { %v311_v36 = vadd.f32 %v473_v34, %v310_v35 }
  0xee   : > { %v545_v37 = vpop.f32.mrf.mxu0 }
  0xef   : > { %v315_v38 = vmul.f32 0.70710677, %v311_v36  ;;  %v314_v40 = vmul.f32 0.5, %v311_v36 }
  0xf1   : > { %591 = verf.f32 %v315_v38 }
  0xfe   : > { %v592_v39 = vpop.eup %591 }
  0xff   : > { %v317_v41 = vadd.f32 1.0, %v592_v39 }
 0x101   : > { %v318_v42 = vmul.f32 %v317_v41, %v314_v40 }
 0x103   : > { %579 = vmatmul.mubr.f32.vlgmr.msra.gmra.mxu1 %v318_v42 }
 0x1c3   : > { %v408_v44 = vpop.f32.mrf.mxu1 }
 0x1c4   : > { %v409_v45 = vadd.f32 %v474_v43, %v408_v44 }
 0x1c5   : > { %v580_v46 = vpop.f32.mrf.mxu1 }
 0x1c6   : > { %412 = vst [vmem:[%s219_s26] sm:$0xff] %v409_v45 }
 0x1c7 PF: > { %s15_s18 = sadd.s32 1, %s599_s18  }
 0x1c8   : > { %p12_p4 = scmp.ge.s32.totalorder %s15_s18, 4  }
 0x1ca   :  { %14 = sbr.rel (!%p12_p4) target bundleno = 1 (0x1), region = 70 }

</bundles_post_ra>
